<compile_context>
chip_gen: v7x
topology: tpu7x:2x2x1
jax: 0.10.0
libtpu: 0.0.40
codegen_flags: <defaults>
</compile_context>

<pallas_src>
import functools

import jax
import jax.numpy as jnp
from jax.experimental import pallas as pl
from jax.experimental.pallas import tpu as pltpu


def _round_up(x, m):
    return ((x + m - 1) // m) * m


@functools.lru_cache(maxsize=1)
def _tpu_info():
    """(vmem_capacity_bytes, tensorcores_per_chip), conservative fallbacks."""
    vmem = 64 * 1024 * 1024          # v7x-safe default
    cores = 1
    try:
        info = pltpu.get_tpu_info()
        vmem = int(getattr(info, "vmem_capacity_bytes", vmem))
        for name in ("num_tensorcores", "tensorcore_count", "num_cores",
                     "cores_per_chip", "tensorcores_per_chip"):
            v = getattr(info, name, None)
            if isinstance(v, int) and v > 0:
                cores = int(v)
                break
    except Exception:
        pass
    if cores == 1:
        try:
            if "v7" in jax.devices()[0].device_kind.lower():
                cores = 2
        except Exception:
            pass
    return vmem, cores


def _pick_block_rows(c_eff, in_item, out_item, vmem_limit, masked):
    """Largest row tile: double-buffered x/out/mask tiles + f32 temps in budget."""
    sub = 16 if min(in_item, out_item) < 4 else 8
    per_row = 2 * c_eff * (in_item + out_item) + (2 * 4 if masked else 0) + 8 * c_eff
    tn = int(vmem_limit * 0.4) // per_row
    tn = max(sub, min(2048, (tn // sub) * sub))
    return tn


# ---------------------------------------------------------------------------
# In-kernel helpers
# ---------------------------------------------------------------------------
def _expand_mask(m, fold, c):
    """(rows, fold) {0,1} mask -> (rows, fold*c); lane p*c+j takes m[:, p]."""
    rows = m.shape[0]
    lane_grp = jax.lax.broadcasted_iota(jnp.int32, (rows, fold * c), 1) // c
    out = jnp.zeros((rows, fold * c), dtype=m.dtype)
    for p in range(fold):
        out = jnp.where(lane_grp == p, m[:, p:p + 1], out)
    return out


# ---------------------------------------------------------------------------
# Kernels
# ---------------------------------------------------------------------------
def _reduce_kernel(*refs, masked, fold, c, tn, n_rows, num_tiles, tpc,
                   guard_tiles, mask_tail):
    """Per-channel masked squared-sum, accumulated over row tiles."""
    if masked:
        x_ref, m_ref, ssum_ref = refs
    else:
        x_ref, ssum_ref = refs
        m_ref = None
    i = pl.program_id(1)

    @pl.when(i == 0)
    def _():
        ssum_ref[...] = jnp.zeros_like(ssum_ref)

    tile_idx = pl.program_id(0) * tpc + i

    def _accumulate():
        x = x_ref[...].astype(jnp.float32)                  # (tn, c*fold)
        contrib = x * x
        if masked:
            m = m_ref[...].astype(jnp.float32)              # (tn, fold)
            if fold > 1:
                m = _expand_mask(m, fold, c)
            contrib = contrib * m
        if mask_tail:
            # Partial last block: OOB rows hold unspecified data -> select 0.
            ridx = tile_idx * tn + jax.lax.broadcasted_iota(jnp.int32, (tn, 1), 0)
            contrib = jnp.where(ridx < n_rows, contrib, 0.0)
        rowsum = jnp.sum(contrib, axis=0, keepdims=True)    # (1, c*fold)
        ssum_ref[...] += jnp.broadcast_to(rowsum, ssum_ref.shape)

    if guard_tiles:
        pl.when(tile_idx < num_tiles)(_accumulate)          # skip padded tiles
    else:
        _accumulate()


def _norm_kernel(*refs, masked, fold, c, compute_dtype):
    """out = (x * mask) * scale + bias; scale/bias packed as (2, c*fold)."""
    if masked:
        x_ref, m_ref, sb_ref, o_ref = refs
    else:
        x_ref, sb_ref, o_ref = refs
        m_ref = None
    sb = sb_ref[...]
    scale = sb[0:1, :].astype(compute_dtype)
    shift = sb[1:2, :].astype(compute_dtype)
    x = x_ref[...].astype(compute_dtype)
    if masked:
        m = m_ref[...]
        if fold > 1:
            m = _expand_mask(m, fold, c)
        x = x * m.astype(compute_dtype)
    # OOB rows of a partial last block are dropped by the store.
    o_ref[...] = (x * scale + shift).astype(o_ref.dtype)


def _fused_kernel(*refs, masked, eps):
    """Grid-less fused reduce + normalize; whole problem resident in VMEM."""
    if masked:
        x_ref, m_ref, p_ref, o_ref, var_ref = refs
    else:
        x_ref, p_ref, o_ref, var_ref = refs
        m_ref = None
    x = x_ref[...].astype(jnp.float32)                      # (N, C)
    if masked:
        x = x * m_ref[...].astype(jnp.float32)
    p = p_ref[...]                                          # (3, C): w, b, 1/sum_size
    var = jnp.sum(x * x, axis=0, keepdims=True) * p[2:3, :]
    var_ref[...] = var
    scale = p[0:1, :] * jax.lax.rsqrt(jnp.maximum(var, eps))
    o_ref[...] = (x * scale + p[1:2, :]).astype(o_ref.dtype)


# ---------------------------------------------------------------------------
# Wrapper
# ---------------------------------------------------------------------------
def mask_power_norm3d(x_tbc, pad_mask, weight, bias, running_var,
                      eps=1e-5, momentum=0.05, training=True, affine=True,
                      block_rows=None, allow_fused=True, allow_fold=True,
                      force_num_cores=None):
    """
    x_tbc:      (T, B, C)
    pad_mask:   (B, T) bool (True = padded) or None
    weight/bias/running_var: (C,)
    Returns (output (T, B, C), new_running_var (C,)).
    """
    T, B, C = x_tbc.shape
    N = T * B
    dt = x_tbc.dtype
    in_item = int(jnp.dtype(dt).itemsize)
    out_item = in_item

    vmem_cap, n_cores = _tpu_info()
    if force_num_cores is not None:
        n_cores = int(force_num_cores)
    vmem_limit = min(int(vmem_cap * 0.75), 96 * 1024 * 1024)

    masked = pad_mask is not None
    x2d = x_tbc.reshape(N, C)
    if masked:
        keep = 1.0 - pad_mask.astype(jnp.float32)           # (B, T)
        mask2d = keep.T.reshape(N, 1)                       # flat row t*B+b -> keep[b, t]
        sum_size = jnp.sum(keep)
    else:
        mask2d = None
        sum_size = jnp.float32(N)
    # TODO(synk): fully-padded input (sum_size == 0) yields inf/NaN exactly like
    # the reference module; no extra guard added.

    w = weight.astype(jnp.float32) if affine else jnp.ones((C,), jnp.float32)
    b = bias.astype(jnp.float32) if affine else jnp.zeros((C,), jnp.float32)

    # ---------------- fused path: one HBM read of x, no pipelining needed ---
    fused_budget = vmem_cap // 2
    if n_cores > 1:
        fused_budget //= 2          # prefer two-pass earlier on multi-TC chips
    fused_bytes = N * C * (in_item + out_item + 8) + 2 * N * 4
    if allow_fused and training and fused_bytes <= fused_budget:
        inv = jnp.broadcast_to(1.0 / sum_size, (C,))
        params = jnp.stack([w, b, inv]).astype(jnp.float32)          # (3, C)
        operands = (x2d, mask2d, params) if masked else (x2d, params)
        vspec = pl.BlockSpec(memory_space=pltpu.MemorySpace.VMEM)
        out, batch_var = pl.pallas_call(
            functools.partial(_fused_kernel, masked=masked, eps=float(eps)),
            out_shape=(jax.ShapeDtypeStruct((N, C), dt),
                       jax.ShapeDtypeStruct((1, C), jnp.float32)),
            in_specs=[vspec] * len(operands),
            out_specs=(vspec, vspec),
            compiler_params=pltpu.CompilerParams(vmem_limit_bytes=vmem_limit),
            cost_estimate=pl.CostEstimate(
                flops=int(6 * N * C), transcendentals=int(C),
                bytes_accessed=int(N * C * (in_item + out_item)
                                   + (N * 4 if masked else 0))),
        )(*operands)
        batch_var = batch_var.reshape(C)
        new_rv = (1.0 - momentum) * running_var + momentum * batch_var
        return out.reshape(T, B, C), new_rv

    # ---------------- two-pass tiled path ----------------
    # Lane-dense folding for narrow channel counts (free row-major reshape).
    fold = 1
    if allow_fold and 8 <= C < 128 and 128 % C == 0 and N % (128 // C) == 0:
        fold = 128 // C
    c_eff = C * fold
    n_rows = N // fold
    x_l = x2d.reshape(n_rows, c_eff) if fold > 1 else x2d
    m_l = None
    if masked:
        m_l = mask2d.reshape(n_rows, fold) if fold > 1 else mask2d

    sub = 16 if min(in_item, out_item) < 4 else 8
    tn = block_rows if block_rows is not None else _pick_block_rows(
        c_eff, in_item, out_item, vmem_limit, masked)
    tn = max(sub, (tn // sub) * sub)
    tn = min(tn, _round_up(n_rows, sub))
    num_tiles = pl.cdiv(n_rows, tn)
    mask_tail = (n_rows % tn) != 0

    if training:
        n_par = n_cores if (n_cores > 1 and num_tiles >= n_cores) else 1
        tpc = pl.cdiv(num_tiles, n_par)
        guard_tiles = (n_par * tpc) != num_tiles

        def tile_map(p, i):
            idx = p * tpc + i
            if guard_tiles:
                idx = jnp.minimum(idx, num_tiles - 1)   # never a fully-OOB DMA
            return (idx, 0)

        in_specs = [pl.BlockSpec((tn, c_eff), tile_map)]
        operands = [x_l]
        if masked:
            in_specs.append(pl.BlockSpec((tn, fold), tile_map))
            operands.append(m_l)

        reduce_fn = functools.partial(
            _reduce_kernel, masked=masked, fold=fold, c=C, tn=tn,
            n_rows=n_rows, num_tiles=num_tiles, tpc=tpc,
            guard_tiles=guard_tiles, mask_tail=mask_tail)

        partials = pl.pallas_call(
            reduce_fn,
            out_shape=jax.ShapeDtypeStruct((n_par * 8, c_eff), jnp.float32),
            grid_spec=pltpu.PrefetchScalarGridSpec(
                num_scalar_prefetch=0,
                grid=(n_par, tpc),
                in_specs=in_specs,
                out_specs=pl.BlockSpec((8, c_eff), lambda p, i: (p, 0))),
            compiler_params=pltpu.CompilerParams(
                dimension_semantics=("parallel", "arbitrary"),
                vmem_limit_bytes=vmem_limit),
            cost_estimate=pl.CostEstimate(
                flops=int(3 * N * C), transcendentals=0,
                bytes_accessed=int(N * C * in_item + (N * 4 if masked else 0))),
        )(*operands)

        per_core = partials.reshape(n_par, 8, c_eff)[:, 0, :]       # (n_par, c_eff)
        ssum = per_core.sum(axis=0)
        if fold > 1:
            ssum = ssum.reshape(fold, C).sum(axis=0)                # (C,)
        batch_var = ssum / sum_size
        new_rv = (1.0 - momentum) * running_var + momentum * batch_var
        var_used = batch_var
    else:
        new_rv = running_var
        var_used = running_var.astype(jnp.float32)

    # scale = weight * rsqrt(clamp(var, eps)) precomputed once; packed with bias.
    scale = w * jax.lax.rsqrt(jnp.maximum(var_used, eps))
    if fold > 1:
        sb = jnp.stack([jnp.tile(scale, fold), jnp.tile(b, fold)])
    else:
        sb = jnp.stack([scale, b])
    sb = sb.astype(jnp.float32)                                     # (2, c_eff)

    compute_dtype = jnp.bfloat16 if dt == jnp.bfloat16 else jnp.float32

    norm_in_specs = [pl.BlockSpec((tn, c_eff), lambda i: (i, 0))]
    norm_operands = [x_l]
    if masked:
        norm_in_specs.append(pl.BlockSpec((tn, fold), lambda i: (i, 0)))
        norm_operands.append(m_l)
    norm_in_specs.append(pl.BlockSpec((2, c_eff), lambda i: (0, 0)))
    norm_operands.append(sb)

    norm_fn = functools.partial(_norm_kernel, masked=masked, fold=fold, c=C,
                                compute_dtype=compute_dtype)

    out_l = pl.pallas_call(
        norm_fn,
        out_shape=jax.ShapeDtypeStruct((n_rows, c_eff), dt),
        grid_spec=pltpu.PrefetchScalarGridSpec(
            num_scalar_prefetch=0,
            grid=(num_tiles,),
            in_specs=norm_in_specs,
            out_specs=pl.BlockSpec((tn, c_eff), lambda i: (i, 0))),
        compiler_params=pltpu.CompilerParams(
            dimension_semantics=("parallel",),
            vmem_limit_bytes=vmem_limit),
        cost_estimate=pl.CostEstimate(
            flops=int(3 * N * C), transcendentals=0,
            bytes_accessed=int(N * C * (in_item + out_item)
                               + (N * 4 if masked else 0))),
    )(*norm_operands)

    return out_l.reshape(T, B, C), new_rv


# ---------------------------------------------------------------------------
# Pure-JAX references (transcription of the PyTorch forward)
# ---------------------------------------------------------------------------
def _reference_forward(x, pad_mask, weight, bias, eps):
    xb = jnp.transpose(x, (1, 0, 2)).astype(jnp.float32)    # B, T, C
    mask = 1.0 - pad_mask.astype(jnp.float32)[..., None]    # B, T, 1
    xb = xb * mask
    sum_size = mask.sum()
    ssum = (xb ** 2).sum(axis=(0, 1), keepdims=True)        # 1, 1, C
    bias_var = ssum / sum_size
    xb = xb / jnp.sqrt(jnp.maximum(bias_var, eps))
    out = xb * weight + bias
    return jnp.transpose(out, (1, 0, 2)), bias_var.reshape(-1)


def _reference_eval(x, pad_mask, weight, bias, running_var, eps):
    xb = jnp.transpose(x, (1, 0, 2)).astype(jnp.float32)
    mask = 1.0 - pad_mask.astype(jnp.float32)[..., None]
    xb = xb * mask
    xb = xb / jnp.sqrt(jnp.maximum(running_var, eps))
    out = xb * weight + bias
    return jnp.transpose(out, (1, 0, 2))


if __name__ == "__main__":
    eps, momentum = 1e-5, 0.05
    ks = jax.random.split(jax.random.PRNGKey(0), 10)

    # 1) small masked case -> fused single-shot path (C=32)
    T, B, C = 8, 2, 32
    x = jax.random.normal(ks[0], (T, B, C), dtype=jnp.float32)
    pm = jax.random.uniform(ks[1], (B, T)) > 0.75
    w = jnp.ones((C,), jnp.float32)
    b = jnp.zeros((C,), jnp.float32)
    rv = jnp.ones((C,), jnp.float32)
    out, new_rv = mask_power_norm3d(x, pm, w, b, rv, eps=eps, momentum=momentum,
                                    training=True)
    out = jax.block_until_ready(out)
    ref_out, ref_var = _reference_forward(x, pm, w, b, eps)
    ref_rv = (1 - momentum) * rv + momentum * ref_var
    assert out.shape == (T, B, C)
    assert jnp.allclose(out, ref_out, atol=1e-5, rtol=1e-5)
    assert jnp.allclose(new_rv, ref_rv, atol=1e-6, rtol=1e-6)

    # 2) folded two-pass (C=32 -> 128 lanes), partial tail tile, forced 2-core
    #    reduce split (exercises the clamped/guarded grid on any chip).
    T2, B2, C2 = 32, 8, 32
    x2 = jax.random.normal(ks[2], (T2, B2, C2), dtype=jnp.float32)
    pm2 = jax.random.uniform(ks[3], (B2, T2)) > 0.8
    w2 = 0.5 + jax.random.uniform(ks[4], (C2,), dtype=jnp.float32)
    b2 = 0.1 * jax.random.normal(ks[5], (C2,), dtype=jnp.float32)
    rv2 = jnp.ones((C2,), jnp.float32)
    out2, new_rv2 = mask_power_norm3d(x2, pm2, w2, b2, rv2, eps=eps,
                                      momentum=momentum, training=True,
                                      allow_fused=False, block_rows=24,
                                      force_num_cores=2)
    out2 = jax.block_until_ready(out2)
    ref_out2, ref_var2 = _reference_forward(x2, pm2, w2, b2, eps)
    ref_rv2 = (1 - momentum) * rv2 + momentum * ref_var2
    assert jnp.allclose(out2, ref_out2, atol=1e-4, rtol=1e-4)
    assert jnp.allclose(new_rv2, ref_rv2, atol=1e-5, rtol=1e-5)

    # 3) unfolded two-pass (C=256), non-divisible N (tail masking), 2-core split
    T3, B3, C3 = 25, 6, 256
    x3 = jax.random.normal(ks[6], (T3, B3, C3), dtype=jnp.float32)
    pm3 = jax.random.uniform(ks[7], (B3, T3)) > 0.8
    w3 = 0.5 + jax.random.uniform(ks[8], (C3,), dtype=jnp.float32)
    b3 = 0.1 * jax.random.normal(ks[9], (C3,), dtype=jnp.float32)
    rv3 = jnp.ones((C3,), jnp.float32)
    out3, new_rv3 = mask_power_norm3d(x3, pm3, w3, b3, rv3, eps=eps,
                                      momentum=momentum, training=True,
                                      allow_fused=False, block_rows=64,
                                      force_num_cores=2)
    out3 = jax.block_until_ready(out3)
    ref_out3, ref_var3 = _reference_forward(x3, pm3, w3, b3, eps)
    ref_rv3 = (1 - momentum) * rv3 + momentum * ref_var3
    assert jnp.allclose(out3, ref_out3, atol=1e-4, rtol=1e-4)
    assert jnp.allclose(new_rv3, ref_rv3, atol=1e-5, rtol=1e-5)

    # 4) eval mode (running_var path, no stat update)
    out_e, rv_e = mask_power_norm3d(x3, pm3, w3, b3, new_rv3, eps=eps,
                                    momentum=momentum, training=False,
                                    allow_fused=False, block_rows=64)
    out_e = jax.block_until_ready(out_e)
    ref_e = _reference_eval(x3, pm3, w3, b3, new_rv3, eps)
    assert jnp.allclose(out_e, ref_e, atol=1e-4, rtol=1e-4)
    assert jnp.allclose(rv_e, new_rv3)

    # 5) pad_mask=None (unmasked kernel specialization): fused and tiled+folded
    T5, B5, C5 = 16, 4, 64
    x5 = jax.random.normal(ks[2], (T5, B5, C5), dtype=jnp.float32)
    w5 = jnp.ones((C5,), jnp.float32)
    b5 = jnp.zeros((C5,), jnp.float32)
    rv5 = jnp.ones((C5,), jnp.float32)
    zero_pm5 = jnp.zeros((B5, T5), dtype=bool)
    ref_out5, ref_var5 = _reference_forward(x5, zero_pm5, w5, b5, eps)
    ref_rv5 = (1 - momentum) * rv5 + momentum * ref_var5
    out5a, rv5a = mask_power_norm3d(x5, None, w5, b5, rv5, eps=eps,
                                    momentum=momentum, training=True)
    out5b, rv5b = mask_power_norm3d(x5, None, w5, b5, rv5, eps=eps,
                                    momentum=momentum, training=True,
                                    allow_fused=False, block_rows=16)
    jax.block_until_ready((out5a, out5b))
    assert jnp.allclose(out5a, ref_out5, atol=1e-5, rtol=1e-5)
    assert jnp.allclose(out5b, ref_out5, atol=1e-4, rtol=1e-4)
    assert jnp.allclose(rv5a, ref_rv5, atol=1e-6, rtol=1e-6)
    assert jnp.allclose(rv5b, ref_rv5, atol=1e-5, rtol=1e-5)

    # 6) bf16 input/output: bf16 norm math, stats accumulated in f32
    xb16 = x2.astype(jnp.bfloat16)
    outb, rvb = mask_power_norm3d(xb16, pm2, w2, b2, rv2, eps=eps,
                                  momentum=momentum, training=True,
                                  allow_fused=False, block_rows=32)
    outb = jax.block_until_ready(outb)
    ref_outb, ref_varb = _reference_forward(xb16.astype(jnp.float32),
                                            pm2, w2, b2, eps)
    ref_rvb = (1 - momentum) * rv2 + momentum * ref_varb
    assert outb.dtype == jnp.bfloat16
    assert jnp.allclose(outb.astype(jnp.float32), ref_outb, atol=5e-2, rtol=5e-2)
    assert jnp.allclose(rvb, ref_rvb, atol=1e-3, rtol=1e-3)

    print("KERNEL_OK")
</pallas_src>

<mosaic_0001>
module attributes {stable_mosaic.version = 11 : i64} {
  func.func @_fused_kernel(%arg0: memref<16x32xf32, #tpu.memory_space<vmem>>, %arg1: memref<16x1xf32, #tpu.memory_space<vmem>>, %arg2: memref<3x32xf32, #tpu.memory_space<vmem>>, %arg3: memref<16x32xf32, #tpu.memory_space<vmem>>, %arg4: memref<1x32xf32, #tpu.memory_space<vmem>>) attributes {dimension_semantics = [], scalar_prefetch = 0 : i64, scratch_operands = 0 : i64, tpu.core_type = #tpu.core_type<tc>} {
    %c0 = arith.constant 0 : index
    %c0_0 = arith.constant 0 : index
    %0 = vector.load %arg0[%c0, %c0_0] : memref<16x32xf32, #tpu.memory_space<vmem>>, vector<16x32xf32>
    %c0_1 = arith.constant 0 : index
    %c0_2 = arith.constant 0 : index
    %1 = vector.load %arg1[%c0_1, %c0_2] : memref<16x1xf32, #tpu.memory_space<vmem>>, vector<16x1xf32>
    %2 = vector.broadcast %1 : vector<16x1xf32> to vector<16x32xf32>
    %3 = arith.mulf %0, %2 : vector<16x32xf32>
    %c0_3 = arith.constant 0 : index
    %c0_4 = arith.constant 0 : index
    %4 = vector.load %arg2[%c0_3, %c0_4] : memref<3x32xf32, #tpu.memory_space<vmem>>, vector<3x32xf32>
    %5 = arith.mulf %3, %3 : vector<16x32xf32>
    %cst = arith.constant dense<0.000000e+00> : vector<32xf32>
    %6 = vector.multi_reduction <add>, %5, %cst [0] : vector<16x32xf32> to vector<32xf32>
    %7 = vector.shape_cast %6 : vector<32xf32> to vector<1x32xf32>
    %8 = vector.extract_strided_slice %4 {offsets = [2, 0], sizes = [1, 32], strides = [1, 1]} : vector<3x32xf32> to vector<1x32xf32>
    %9 = arith.mulf %7, %8 : vector<1x32xf32>
    %c0_5 = arith.constant 0 : index
    %c0_6 = arith.constant 0 : index
    %10 = vector.load %arg4[%c0_5, %c0_6] : memref<1x32xf32, #tpu.memory_space<vmem>>, vector<1x32xf32>
    tpu.vector_store %arg4[%c0_5, %c0_6], %9 {strides = array<i32>} : memref<1x32xf32, #tpu.memory_space<vmem>>, vector<1x32xf32>,
    %11 = vector.extract_strided_slice %4 {offsets = [0, 0], sizes = [1, 32], strides = [1, 1]} : vector<3x32xf32> to vector<1x32xf32>
    %cst_7 = arith.constant 9.99999974E-6 : f32
    %12 = vector.broadcast %cst_7 : f32 to vector<1x32xf32>
    %13 = arith.maximumf %9, %12 : vector<1x32xf32>
    %14 = math.rsqrt %13 : vector<1x32xf32>
    %15 = arith.mulf %11, %14 : vector<1x32xf32>
    %16 = vector.broadcast %15 : vector<1x32xf32> to vector<16x32xf32>
    %17 = arith.mulf %3, %16 : vector<16x32xf32>
    %18 = vector.extract_strided_slice %4 {offsets = [1, 0], sizes = [1, 32], strides = [1, 1]} : vector<3x32xf32> to vector<1x32xf32>
    %19 = vector.broadcast %18 : vector<1x32xf32> to vector<16x32xf32>
    %20 = arith.addf %17, %19 : vector<16x32xf32>
    %c0_8 = arith.constant 0 : index
    %c0_9 = arith.constant 0 : index
    %21 = vector.load %arg3[%c0_8, %c0_9] : memref<16x32xf32, #tpu.memory_space<vmem>>, vector<16x32xf32>
    tpu.vector_store %arg3[%c0_8, %c0_9], %20 {strides = array<i32>} : memref<16x32xf32, #tpu.memory_space<vmem>>, vector<16x32xf32>,
    return
  }
}

</mosaic_0001>

<bundles_post_ra>
// kernel: tpu_custom_call.1
= control target key start
LH: loop header
LB: loop body
LE: loop exit
PB: predicated region body
PF: predicated region fallthrough
CT: control target
= control target key end

     0   :  { %10 = vsyncpa [#allocation3], 0  ;;  %s229_s0 = inlined_call_operand.vmem [shape: f32[16,32], index: 0, kind: input, shape index: {}]   ;;  %s230_s1 = inlined_call_operand.vmem [shape: f32[16,1], index: 1, kind: input, shape index: {}]   ;;  %s231_s2 = inlined_call_operand.vmem [shape: f32[3,32], index: 2, kind: input, shape index: {}]   ;;  %s232_s3 = inlined_call_operand.hbm [shape: f32[16,32], index: 3, kind: output, shape index: {0}]   ;;  %s233_s4 = inlined_call_operand.hbm [shape: f32[1,32], index: 4, kind: output, shape index: {1}]  }
   0x1   :  { %v20_v0 = vld [vmem:[%s230_s1] sm:$0xff] }
   0x2   :  { %11 = vsyncpa [#allocation5], 0  ;;  %v156_v1 = vmov 0   ;;  %v21_v2 = vld [vmem:[%s230_s1 + $0x8] sm:$0xff]  ;;  %v18_v3 = vld [vmem:[%s229_s0] sm:$0xff]  ;;  %vm37_vm0 = vcmask 261120  }
   0x3   :  { %105 = vset.pattern.permute.xlu0 %v156_v1  ;;  %v19_v6 = vld [vmem:[%s229_s0 + $0x8] sm:$0xff]  ;;  %v34_v19 = vld [vmem:[%s231_s2] sm:$0x7]  ;;  %s157_s0 = smov [#allocation4]   ;;  %vm48_vm1 = vcmask 256002  }
   0x4   :  { %24 = vperm.xlu0 %105, %v20_v0   ;;  %s88_s24 = sshll.u32 %s157_s0, 4  ;;  %s89_s24 = int_to_ptr.vmem [resolvable:$true] %s88_s24 }
   0x5   :  { %s108_s25 = scalar_lea.vmem %s89_s24, 16  ;;  %s112_s26 = scalar_lea.vmem %s89_s24, 32 }
   0x6   :  { %p109_p0 = scmp.ne.s32.totalorder %s89_s24, %s108_s25  ;;  %p113_p1 = scmp.lt.s32.totalorder %s89_s24, %s89_s24 }
   0x7   :  { %p114_p2 = scmp.lt.s32.totalorder %s112_s26, %s108_s25 }
   0x8   :  { %29 = vperm.xlu0 %105, %v21_v2  }
   0x9   :  { %p115_p3 = por %p114_p2, %p113_p1 }
   0xb   :  { %p116_p4 = pnand %p115_p3, %p109_p0 }
  0x83   :  { %v25_v4 = vpop.permute.xlu0 %24 }
  0x84   :  { %v32_v5 = vmul.f32 %v25_v4, %v18_v3 }
  0x86   :  { %v35_v8 = vmul.f32 %v32_v5, %v32_v5 }
  0x87   :  { %v30_v7 = vpop.permute.xlu0 %29 }
  0x88   :  { %v33_v9 = vmul.f32 %v30_v7, %v19_v6  ;;  %v38_v11 = vsel %vm37_vm0, %v35_v8, 0.0 }
  0x8a   :  { %v36_v10 = vmul.f32 %v33_v9, %v33_v9 }
  0x8c   :  { %v39_v12 = vsel %vm37_vm0, %v36_v10, 0.0 }
  0x8d   :  { %v40_v13 = vadd.f32 %v39_v12, %v38_v11 }
  0x8f   :  { %v41_v14 = vrot.slane %v40_v13, 4 }
  0x91   :  { %v42_v15 = vadd.f32 %v41_v14, %v40_v13 }
  0x93   :  { %v43_v16 = vrot.slane %v42_v15, 2 }
  0x95   :  { %v44_v17 = vadd.f32 %v43_v16, %v42_v15 }
  0x97   :  { %v45_v18 = vrot.slane %v44_v17, 1 }
  0x99   :  { %v46_v20 = vadd.f32 %v45_v18, %v44_v17 }
  0x9b   :  { %v47_v21 = vmul.f32 %v46_v20, %v34_v19 }
  0x9d   :  { %v50_v22 = vmax.f32 %v47_v21, 1e-05  ;;  %49 = vst.msk [vmem:[#allocation4 - $0x2] sm:$0x4] %vm48_vm1, %v47_v21 }
  0x9e   :  { %119 = shalt.err (!%p116_p4)
}
  0x9f   :  { %s120_s2 = scalar_lea.hbm %s233_s4, 16 }
  0xa0   :  { %p121_p5 = scmp.ne.s32.totalorder %s233_s4, %s120_s2  ;;  %p124_p6 = scmp.lt.u32.totalorder %s120_s2, %s233_s4 }
  0xa2   :  { %p126_p7 = pnand %p124_p6, %p121_p5 }
  0xa4   :  { %129 = shalt.err (!%p126_p7)
}
  0xa5   :  { %91 = dma.vmem_to_hbm [thread:$0]  %s89_s24, 16, %s233_s4, [#allocation5]   ;;  %106 = vrsqrt.f32 %v50_v22  ;;  %v56_v23 = vlaneseq }
  0xa6   :  { %s158_s9 = smov [#allocation2]  }
  0xa7   :  { %v57_v24 = vshrl.u32 %v56_v23, 7  ;;  %s75_s10 = sshll.u32 %s158_s9, 4  ;;  %s76_s10 = int_to_ptr.vmem [resolvable:$true] %s75_s10 }
  0xa8   :  { %s130_s4 = scalar_lea.vmem %s76_s10, 256  ;;  %p135_p9 = scmp.lt.s32.totalorder %s76_s10, %s76_s10 }
  0xa9   :  { %v58_v26 = vsub.s32 0, %v57_v24  ;;  %v64_v27 = vsub.s32 1, %v57_v24  ;;  %p131_p8 = scmp.ne.s32.totalorder %s76_s10, %s130_s4  ;;  %p136_p10 = scmp.lt.s32.totalorder %s130_s4, %s130_s4 }
  0xab   :  { %v65_v30 = vrot.slane %v34_v19, %v64_v27  ;;  %p137_p11 = por %p136_p10, %p135_p9 }
  0xad   :  { %p138_p12 = pnand %p137_p11, %p131_p8 }
  0xaf   :  { %v107_v25 = vpop.eup %106 }
  0xb0   :  { %v53_v28 = vrot.slane %v107_v25, 2 }
  0xb2   :  { %v55_v29 = vmul.f32 %v53_v28, %v34_v19 }
  0xb4   :  { %v59_v31 = vrot.slane %v55_v29, %v58_v26 }
  0xb6   :  { %v60_v32 = vmul.f32 %v59_v31, %v32_v5  ;;  %v61_v33 = vmul.f32 %v59_v31, %v33_v9 }
  0xb8   :  { %v67_v34 = vadd.f32 %v65_v30, %v61_v33  ;;  %v66_v35 = vadd.f32 %v65_v30, %v60_v32 }
  0xba   :  { %69 = vst.msk [vmem:[#allocation2 + $0x8] sm:$0xff] %vm37_vm0, %v67_v34  ;;  %68 = vst.msk [vmem:[#allocation2] sm:$0xff] %vm37_vm0, %v66_v35 }
  0xbb   :  { %141 = shalt.err (!%p138_p12)
}
  0xbc   :  { %s142_s13 = scalar_lea.hbm %s232_s3, 256 }
  0xbd   :  { %p143_p13 = scmp.ne.s32.totalorder %s232_s3, %s142_s13  ;;  %p146_p0 = scmp.lt.u32.totalorder %s142_s13, %s232_s3 }
  0xbf   :  { %p148_p1 = pnand %p146_p0, %p143_p13 }
  0xc1   :  { %151 = shalt.err (!%p148_p1)
}
  0xc2   :  { %s159_s18 = smov 128   ;;  %s160_s19 = smov 8  }
  0xc3   :  { %81 = dma.vmem_to_hbm [thread:$0]  %s76_s10, 256, %s232_s3, [#allocation3], %s159_s18, %s159_s18, %s160_s19  }
  0xc4   :  { %152 = dma.done.wait [#allocation3], 256  }
  0xc5   :  { %153 = vsyncadd [#allocation3], 4294967040 }
  0xc6   :  { %154 = dma.done.wait [#allocation5], 16  }
  0xc7   :  { %155 = vsyncadd [#allocation5], 4294967280 }
  0xc8   :  { %98 = vsyncpa [#allocation3], 1 }
  0xc9   :  { %99 = vsyncpa [#allocation5], 1 }

</bundles_post_ra>
